<compile_context>
chip_gen: v6e
topology: v6e:2x2x1
jax: 0.10.0
libtpu: 0.0.40
codegen_flags: <defaults>
</compile_context>

<pallas_src>
import functools

import numpy as np
import jax
import jax.numpy as jnp
from jax import lax
from jax.experimental import pallas as pl
from jax.experimental.pallas import tpu as pltpu


def _newsvendor_kernel(y_ref, ds_ref, dn_ref, out_ref, *, c_lin, c_quad, b_lin,
                       b_quad, h_lin, h_quad, k, big):
    y = y_ref[...]                       # (TB, Kp) y, columns permuted by argsort(d)
    ds = ds_ref[...]                     # (1,  Kp) sorted d (zeros past lane k-1)
    dn = dn_ref[...]                     # (1,  Kp) next sorted d (BIG past the last)
    _, kp = y.shape

    lane = lax.broadcasted_iota(jnp.int32, (1, kp), 1)
    real = lane < k                      # mask of real demand scenarios

    yd = y * ds                          # (TB, Kp)  y_j * d_j (0 on padded lanes)
    y_tot = jnp.sum(y, axis=-1, keepdims=True)     # (TB, 1)
    yd_tot = jnp.sum(yd, axis=-1, keepdims=True)   # (TB, 1)

    # Inclusive prefix sums along the sorted-demand axis on the (otherwise idle) MXU:
    # tri[i, m] = 1 if i <= m, so (y @ tri)[:, m] = sum_{i<=m} y_i.
    row = lax.broadcasted_iota(jnp.int32, (kp, kp), 0)
    col = lax.broadcasted_iota(jnp.int32, (kp, kp), 1)
    tri = (row <= col).astype(jnp.float32)
    cum_y = jnp.dot(y, tri, precision=lax.Precision.HIGHEST,
                    preferred_element_type=jnp.float32)
    cum_yd = jnp.dot(yd, tri, precision=lax.Precision.HIGHEST,
                     preferred_element_type=jnp.float32)

    # Lane j = segment [ds_j, dn_j]; active set = sorted demands <= z.
    # On the segment:  f'(z) = a + b*z  with the coefficients below.
    y_gt = y_tot - cum_y
    yd_gt = yd_tot - cum_yd
    a = (c_lin + h_lin * cum_y - h_quad * cum_yd
         - b_lin * y_gt - b_quad * yd_gt)
    bq = c_quad + h_quad * cum_y + b_quad * y_gt
    d_right = a + bq * ds                          # right derivative at breakpoint
    root = -a / jnp.maximum(bq, 1e-30)
    cand = jnp.minimum(root, dn)
    cand = jnp.where(jnp.logical_and(real, d_right < 0.0), cand, 0.0)
    z_hat = jnp.max(cand, axis=-1, keepdims=True)  # (TB, 1)

    # Leftmost segment [0, min(d)] with empty active set.
    a0 = c_lin - b_lin * y_tot - b_quad * yd_tot
    b0 = c_quad + b_quad * y_tot
    cand0 = jnp.minimum(-a0 / jnp.maximum(b0, 1e-30), ds[:, 0:1])
    z_hat = jnp.maximum(z_hat, jnp.where(a0 < 0.0, cand0, 0.0))

    # Exact polish of the selected segment with element-wise f32 + lane reductions
    # (result independent of MXU pass precision).
    act = jnp.logical_and(ds <= z_hat, real)       # (TB, Kp)
    y_le = jnp.sum(jnp.where(act, y, 0.0), axis=-1, keepdims=True)
    yd_le = jnp.sum(jnp.where(act, yd, 0.0), axis=-1, keepdims=True)
    a_e = (c_lin + h_lin * y_le - h_quad * yd_le
           - b_lin * (y_tot - y_le) - b_quad * (yd_tot - yd_le))
    b_e = c_quad + h_quad * y_le + b_quad * (y_tot - y_le)
    root_e = -a_e / jnp.maximum(b_e, 1e-30)
    lo = jnp.max(jnp.where(act, ds, 0.0), axis=-1, keepdims=True)
    hi = jnp.min(jnp.where(jnp.logical_and(real, jnp.logical_not(act)), ds, big),
                 axis=-1, keepdims=True)
    z0 = jnp.maximum(jnp.clip(root_e, lo, hi), 0.0)   # (TB, 1)

    out_ref[...] = jnp.broadcast_to(z0, out_ref.shape)  # lane-dense store


def solve_newsvendor(y, d, params):
    """Pallas equivalent of SolveNewsvendor.forward: returns (batch, 1) z0*."""
    y = jnp.asarray(y, jnp.float32)
    d = jnp.asarray(d, jnp.float32)
    b, k = y.shape
    big = 1e30

    # Sort the (shared, constant) demand support once and permute y's columns.
    order = jnp.argsort(d)
    d_sorted = d[order]
    y_sorted = y[:, order]
    d_next = jnp.concatenate([d_sorted[1:], jnp.full((1,), big, jnp.float32)])

    kp = ((k + 127) // 128) * 128
    b8 = ((b + 7) // 8) * 8
    tb = min(b8, 512)                     # batch tile: sweet spot, VMEM-safe on v5e
    bp = ((b8 + tb - 1) // tb) * tb

    y_p = jnp.zeros((bp, kp), jnp.float32).at[:b, :k].set(y_sorted)
    ds_p = jnp.zeros((1, kp), jnp.float32).at[0, :k].set(d_sorted)
    dn_p = jnp.full((1, kp), big, jnp.float32).at[0, :k].set(d_next)

    kernel = functools.partial(
        _newsvendor_kernel,
        c_lin=float(params["c_lin"]), c_quad=float(params["c_quad"]),
        b_lin=float(params["b_lin"]), b_quad=float(params["b_quad"]),
        h_lin=float(params["h_lin"]), h_quad=float(params["h_quad"]),
        k=int(k), big=big)

    out = pl.pallas_call(
        kernel,
        out_shape=jax.ShapeDtypeStruct((bp, 128), jnp.float32),
        grid_spec=pltpu.PrefetchScalarGridSpec(
            num_scalar_prefetch=0,
            grid=(bp // tb,),
            in_specs=[pl.BlockSpec((tb, kp), lambda i: (i, 0)),
                      pl.BlockSpec((1, kp), lambda i: (0, 0)),
                      pl.BlockSpec((1, kp), lambda i: (0, 0))],
            out_specs=pl.BlockSpec((tb, 128), lambda i: (i, 0))),
        compiler_params=pltpu.CompilerParams(
            dimension_semantics=("parallel",)),
    )(y_p, ds_p, dn_p)

    return out[:b, :1]


def _reference_z0(y, d, params):
    """Brute-force the reduced convex objective on a fine grid (numpy)."""
    y = np.asarray(y, np.float64)
    d = np.asarray(d, np.float64)
    zs = np.linspace(0.0, float(d.max()) + 1.0, 180001)          # (Z,)
    short = d[None, :, None] - zs[None, None, :]                 # (1, k, Z)
    pen = (params["b_lin"] * np.maximum(short, 0.0)
           + 0.5 * params["b_quad"] * np.maximum(short, 0.0) ** 2
           + params["h_lin"] * np.maximum(-short, 0.0)
           + 0.5 * params["h_quad"] * np.maximum(-short, 0.0) ** 2)
    f = (params["c_lin"] * zs[None, :]
         + 0.5 * params["c_quad"] * zs[None, :] ** 2
         + np.einsum("bk,bkz->bz", y, np.broadcast_to(pen, (y.shape[0],) + pen.shape[1:])))
    return zs[np.argmin(f, axis=1)]                              # (B,)


if __name__ == "__main__":
    batch, k = 2, 8
    params = {
        "c_lin": 10.0, "c_quad": 2.0,
        "b_lin": 30.0, "b_quad": 14.0,
        "h_lin": 10.0, "h_quad": 2.0,
        "d": np.arange(1.0, k + 1.0, dtype=np.float32),          # demand support, len k
    }

    key = jax.random.PRNGKey(0)
    logits = jax.random.normal(key, (batch, k), dtype=jnp.float32)
    y = jax.nn.softmax(logits, axis=-1)   # non-negative demand distribution (as upstream)

    z0 = solve_newsvendor(y, params["d"], params)
    z0 = jax.block_until_ready(z0)
    assert z0.shape == (batch, 1) and z0.dtype == jnp.float32

    z_ref = _reference_z0(np.asarray(y), params["d"], params)
    assert np.max(np.abs(np.asarray(z0)[:, 0] - z_ref)) < 1e-3, (z0, z_ref)

    print("KERNEL_OK")
</pallas_src>

<mosaic_0001>
module attributes {stable_mosaic.version = 11 : i64} {
  func.func @_newsvendor_kernel(%arg0: i32, %arg1: memref<8x128xf32, #tpu.memory_space<vmem>>, %arg2: memref<1x128xf32, #tpu.memory_space<vmem>>, %arg3: memref<1x128xf32, #tpu.memory_space<vmem>>, %arg4: memref<8x128xf32, #tpu.memory_space<vmem>>) attributes {dimension_semantics = [#tpu.dimension_semantics<parallel>], iteration_bounds = array<i64: 1>, scalar_prefetch = 0 : i64, scratch_operands = 0 : i64, tpu.core_type = #tpu.core_type<tc>, window_params = [{transform_indices = @transform_0, window_bounds = array<i64: 8, 128>}, {pipeline_mode = #tpu.pipeline_mode<synchronous>, transform_indices = @transform_1, window_bounds = array<i64: 1, 128>}, {pipeline_mode = #tpu.pipeline_mode<synchronous>, transform_indices = @transform_2, window_bounds = array<i64: 1, 128>}, {transform_indices = @transform_3, window_bounds = array<i64: 8, 128>}]} {
    %c0 = arith.constant 0 : index
    %c0_0 = arith.constant 0 : index
    %0 = vector.load %arg1[%c0, %c0_0] : memref<8x128xf32, #tpu.memory_space<vmem>>, vector<8x128xf32>
    %c0_1 = arith.constant 0 : index
    %c0_2 = arith.constant 0 : index
    %1 = vector.load %arg2[%c0_1, %c0_2] : memref<1x128xf32, #tpu.memory_space<vmem>>, vector<1x128xf32>
    %c0_3 = arith.constant 0 : index
    %c0_4 = arith.constant 0 : index
    %2 = vector.load %arg3[%c0_3, %c0_4] : memref<1x128xf32, #tpu.memory_space<vmem>>, vector<1x128xf32>
    %3 = tpu.iota {dimensions = array<i32: 1>} : vector<1x128xi32>
    %c8_i32 = arith.constant 8 : i32
    %4 = vector.broadcast %c8_i32 : i32 to vector<1x128xi32>
    %5 = arith.cmpi slt, %3, %4 : vector<1x128xi32>
    %6 = vector.broadcast %1 : vector<1x128xf32> to vector<8x128xf32>
    %7 = arith.mulf %0, %6 : vector<8x128xf32>
    %cst = arith.constant dense<0.000000e+00> : vector<8xf32>
    %8 = vector.multi_reduction <add>, %0, %cst [1] : vector<8x128xf32> to vector<8xf32>
    %9 = vector.shape_cast %8 : vector<8xf32> to vector<8x1xf32>
    %cst_5 = arith.constant dense<0.000000e+00> : vector<8xf32>
    %10 = vector.multi_reduction <add>, %7, %cst_5 [1] : vector<8x128xf32> to vector<8xf32>
    %11 = vector.shape_cast %10 : vector<8xf32> to vector<8x1xf32>
    %12 = tpu.iota {dimensions = array<i32: 0>} : vector<128x128xi32>
    %13 = tpu.iota {dimensions = array<i32: 1>} : vector<128x128xi32>
    %14 = arith.cmpi sle, %12, %13 : vector<128x128xi32>
    %15 = arith.extui %14 : vector<128x128xi1> to vector<128x128xi32>
    %16 = arith.sitofp %15 : vector<128x128xi32> to vector<128x128xf32>
    %cst_6 = arith.constant dense<0.000000e+00> : vector<8x128xf32>
    %17 = tpu.matmul %0, %16, %cst_6 {dimension_numbers = #tpu.dot_dimension_numbers<[1], [0], [0], [1], [0, 0, 1, 1], [], []>, precision = #tpu.contract_precision<fp32>} : vector<8x128xf32>, vector<128x128xf32>, vector<8x128xf32> -> vector<8x128xf32>
    %cst_7 = arith.constant dense<0.000000e+00> : vector<8x128xf32>
    %18 = tpu.matmul %7, %16, %cst_7 {dimension_numbers = #tpu.dot_dimension_numbers<[1], [0], [0], [1], [0, 0, 1, 1], [], []>, precision = #tpu.contract_precision<fp32>} : vector<8x128xf32>, vector<128x128xf32>, vector<8x128xf32> -> vector<8x128xf32>
    %19 = vector.broadcast %9 : vector<8x1xf32> to vector<8x128xf32>
    %20 = arith.subf %19, %17 : vector<8x128xf32>
    %21 = vector.broadcast %11 : vector<8x1xf32> to vector<8x128xf32>
    %22 = arith.subf %21, %18 : vector<8x128xf32>
    %cst_8 = arith.constant 1.000000e+01 : f32
    %23 = vector.broadcast %cst_8 : f32 to vector<8x128xf32>
    %24 = arith.mulf %23, %17 : vector<8x128xf32>
    %cst_9 = arith.constant 1.000000e+01 : f32
    %25 = vector.broadcast %cst_9 : f32 to vector<8x128xf32>
    %26 = arith.addf %25, %24 : vector<8x128xf32>
    %cst_10 = arith.constant 2.000000e+00 : f32
    %27 = vector.broadcast %cst_10 : f32 to vector<8x128xf32>
    %28 = arith.mulf %27, %18 : vector<8x128xf32>
    %29 = arith.subf %26, %28 : vector<8x128xf32>
    %cst_11 = arith.constant 3.000000e+01 : f32
    %30 = vector.broadcast %cst_11 : f32 to vector<8x128xf32>
    %31 = arith.mulf %30, %20 : vector<8x128xf32>
    %32 = arith.subf %29, %31 : vector<8x128xf32>
    %cst_12 = arith.constant 1.400000e+01 : f32
    %33 = vector.broadcast %cst_12 : f32 to vector<8x128xf32>
    %34 = arith.mulf %33, %22 : vector<8x128xf32>
    %35 = arith.subf %32, %34 : vector<8x128xf32>
    %cst_13 = arith.constant 2.000000e+00 : f32
    %36 = vector.broadcast %cst_13 : f32 to vector<8x128xf32>
    %37 = arith.mulf %36, %17 : vector<8x128xf32>
    %cst_14 = arith.constant 2.000000e+00 : f32
    %38 = vector.broadcast %cst_14 : f32 to vector<8x128xf32>
    %39 = arith.addf %38, %37 : vector<8x128xf32>
    %cst_15 = arith.constant 1.400000e+01 : f32
    %40 = vector.broadcast %cst_15 : f32 to vector<8x128xf32>
    %41 = arith.mulf %40, %20 : vector<8x128xf32>
    %42 = arith.addf %39, %41 : vector<8x128xf32>
    %43 = vector.broadcast %1 : vector<1x128xf32> to vector<8x128xf32>
    %44 = arith.mulf %42, %43 : vector<8x128xf32>
    %45 = arith.addf %35, %44 : vector<8x128xf32>
    %cst_16 = arith.constant 0.000000e+00 : f32
    %46 = vector.broadcast %cst_16 : f32 to vector<8x128xf32>
    %47 = arith.subf %46, %35 : vector<8x128xf32>
    %cst_17 = arith.constant 1.000000e-30 : f32
    %48 = vector.broadcast %cst_17 : f32 to vector<8x128xf32>
    %49 = arith.maximumf %42, %48 : vector<8x128xf32>
    %50 = arith.divf %47, %49 : vector<8x128xf32>
    %51 = vector.broadcast %2 : vector<1x128xf32> to vector<8x128xf32>
    %52 = arith.minimumf %50, %51 : vector<8x128xf32>
    %cst_18 = arith.constant 0.000000e+00 : f32
    %53 = vector.broadcast %cst_18 : f32 to vector<8x128xf32>
    %54 = arith.cmpf olt, %45, %53 : vector<8x128xf32>
    %55 = vector.broadcast %5 : vector<1x128xi1> to vector<8x128xi1>
    %56 = arith.andi %55, %54 : vector<8x128xi1>
    %cst_19 = arith.constant 0.000000e+00 : f32
    %57 = vector.broadcast %cst_19 : f32 to vector<8x128xf32>
    %58 = arith.select %56, %52, %57 : vector<8x128xi1>, vector<8x128xf32>
    %cst_20 = arith.constant dense<0xFF800000> : vector<8xf32>
    %59 = vector.multi_reduction <maximumf>, %58, %cst_20 [1] : vector<8x128xf32> to vector<8xf32>
    %60 = vector.shape_cast %59 : vector<8xf32> to vector<8x1xf32>
    %cst_21 = arith.constant 3.000000e+01 : f32
    %61 = vector.broadcast %cst_21 : f32 to vector<8x1xf32>
    %62 = arith.mulf %61, %9 : vector<8x1xf32>
    %cst_22 = arith.constant 1.000000e+01 : f32
    %63 = vector.broadcast %cst_22 : f32 to vector<8x1xf32>
    %64 = arith.subf %63, %62 : vector<8x1xf32>
    %cst_23 = arith.constant 1.400000e+01 : f32
    %65 = vector.broadcast %cst_23 : f32 to vector<8x1xf32>
    %66 = arith.mulf %65, %11 : vector<8x1xf32>
    %67 = arith.subf %64, %66 : vector<8x1xf32>
    %cst_24 = arith.constant 1.400000e+01 : f32
    %68 = vector.broadcast %cst_24 : f32 to vector<8x1xf32>
    %69 = arith.mulf %68, %9 : vector<8x1xf32>
    %cst_25 = arith.constant 2.000000e+00 : f32
    %70 = vector.broadcast %cst_25 : f32 to vector<8x1xf32>
    %71 = arith.addf %70, %69 : vector<8x1xf32>
    %cst_26 = arith.constant 0.000000e+00 : f32
    %72 = vector.broadcast %cst_26 : f32 to vector<8x1xf32>
    %73 = arith.subf %72, %67 : vector<8x1xf32>
    %cst_27 = arith.constant 1.000000e-30 : f32
    %74 = vector.broadcast %cst_27 : f32 to vector<8x1xf32>
    %75 = arith.maximumf %71, %74 : vector<8x1xf32>
    %76 = arith.divf %73, %75 : vector<8x1xf32>
    %77 = vector.extract_strided_slice %1 {offsets = [0, 0], sizes = [1, 1], strides = [1, 1]} : vector<1x128xf32> to vector<1x1xf32>
    %78 = vector.broadcast %77 : vector<1x1xf32> to vector<8x1xf32>
    %79 = arith.minimumf %76, %78 : vector<8x1xf32>
    %cst_28 = arith.constant 0.000000e+00 : f32
    %80 = vector.broadcast %cst_28 : f32 to vector<8x1xf32>
    %81 = arith.cmpf olt, %67, %80 : vector<8x1xf32>
    %cst_29 = arith.constant 0.000000e+00 : f32
    %82 = vector.broadcast %cst_29 : f32 to vector<8x1xf32>
    %83 = arith.select %81, %79, %82 : vector<8x1xi1>, vector<8x1xf32>
    %84 = arith.maximumf %60, %83 : vector<8x1xf32>
    %85 = vector.broadcast %1 : vector<1x128xf32> to vector<8x128xf32>
    %86 = vector.broadcast %84 : vector<8x1xf32> to vector<8x128xf32>
    %87 = arith.cmpf ole, %85, %86 : vector<8x128xf32>
    %88 = vector.broadcast %5 : vector<1x128xi1> to vector<8x128xi1>
    %89 = arith.andi %87, %88 : vector<8x128xi1>
    %cst_30 = arith.constant 0.000000e+00 : f32
    %90 = vector.broadcast %cst_30 : f32 to vector<8x128xf32>
    %91 = arith.select %89, %0, %90 : vector<8x128xi1>, vector<8x128xf32>
    %cst_31 = arith.constant dense<0.000000e+00> : vector<8xf32>
    %92 = vector.multi_reduction <add>, %91, %cst_31 [1] : vector<8x128xf32> to vector<8xf32>
    %93 = vector.shape_cast %92 : vector<8xf32> to vector<8x1xf32>
    %cst_32 = arith.constant 0.000000e+00 : f32
    %94 = vector.broadcast %cst_32 : f32 to vector<8x128xf32>
    %95 = arith.select %89, %7, %94 : vector<8x128xi1>, vector<8x128xf32>
    %cst_33 = arith.constant dense<0.000000e+00> : vector<8xf32>
    %96 = vector.multi_reduction <add>, %95, %cst_33 [1] : vector<8x128xf32> to vector<8xf32>
    %97 = vector.shape_cast %96 : vector<8xf32> to vector<8x1xf32>
    %cst_34 = arith.constant 1.000000e+01 : f32
    %98 = vector.broadcast %cst_34 : f32 to vector<8x1xf32>
    %99 = arith.mulf %98, %93 : vector<8x1xf32>
    %cst_35 = arith.constant 1.000000e+01 : f32
    %100 = vector.broadcast %cst_35 : f32 to vector<8x1xf32>
    %101 = arith.addf %100, %99 : vector<8x1xf32>
    %cst_36 = arith.constant 2.000000e+00 : f32
    %102 = vector.broadcast %cst_36 : f32 to vector<8x1xf32>
    %103 = arith.mulf %102, %97 : vector<8x1xf32>
    %104 = arith.subf %101, %103 : vector<8x1xf32>
    %105 = arith.subf %9, %93 : vector<8x1xf32>
    %cst_37 = arith.constant 3.000000e+01 : f32
    %106 = vector.broadcast %cst_37 : f32 to vector<8x1xf32>
    %107 = arith.mulf %106, %105 : vector<8x1xf32>
    %108 = arith.subf %104, %107 : vector<8x1xf32>
    %109 = arith.subf %11, %97 : vector<8x1xf32>
    %cst_38 = arith.constant 1.400000e+01 : f32
    %110 = vector.broadcast %cst_38 : f32 to vector<8x1xf32>
    %111 = arith.mulf %110, %109 : vector<8x1xf32>
    %112 = arith.subf %108, %111 : vector<8x1xf32>
    %cst_39 = arith.constant 2.000000e+00 : f32
    %113 = vector.broadcast %cst_39 : f32 to vector<8x1xf32>
    %114 = arith.mulf %113, %93 : vector<8x1xf32>
    %cst_40 = arith.constant 2.000000e+00 : f32
    %115 = vector.broadcast %cst_40 : f32 to vector<8x1xf32>
    %116 = arith.addf %115, %114 : vector<8x1xf32>
    %117 = arith.subf %9, %93 : vector<8x1xf32>
    %cst_41 = arith.constant 1.400000e+01 : f32
    %118 = vector.broadcast %cst_41 : f32 to vector<8x1xf32>
    %119 = arith.mulf %118, %117 : vector<8x1xf32>
    %120 = arith.addf %116, %119 : vector<8x1xf32>
    %cst_42 = arith.constant 0.000000e+00 : f32
    %121 = vector.broadcast %cst_42 : f32 to vector<8x1xf32>
    %122 = arith.subf %121, %112 : vector<8x1xf32>
    %cst_43 = arith.constant 1.000000e-30 : f32
    %123 = vector.broadcast %cst_43 : f32 to vector<8x1xf32>
    %124 = arith.maximumf %120, %123 : vector<8x1xf32>
    %125 = arith.divf %122, %124 : vector<8x1xf32>
    %cst_44 = arith.constant 0.000000e+00 : f32
    %126 = vector.shape_cast %1 : vector<1x128xf32> to vector<1x128xf32>
    %127 = vector.broadcast %126 : vector<1x128xf32> to vector<8x128xf32>
    %128 = vector.broadcast %cst_44 : f32 to vector<8x128xf32>
    %129 = arith.select %89, %127, %128 : vector<8x128xi1>, vector<8x128xf32>
    %cst_45 = arith.constant dense<0xFF800000> : vector<8xf32>
    %130 = vector.multi_reduction <maximumf>, %129, %cst_45 [1] : vector<8x128xf32> to vector<8xf32>
    %131 = vector.shape_cast %130 : vector<8xf32> to vector<8x1xf32>
    %cst_46 = arith.constant dense<true> : vector<8x128xi1>
    %132 = arith.xori %89, %cst_46 : vector<8x128xi1>
    %133 = vector.broadcast %5 : vector<1x128xi1> to vector<8x128xi1>
    %134 = arith.andi %133, %132 : vector<8x128xi1>
    %cst_47 = arith.constant 1.000000e+30 : f32
    %135 = vector.shape_cast %1 : vector<1x128xf32> to vector<1x128xf32>
    %136 = vector.broadcast %135 : vector<1x128xf32> to vector<8x128xf32>
    %137 = vector.broadcast %cst_47 : f32 to vector<8x128xf32>
    %138 = arith.select %134, %136, %137 : vector<8x128xi1>, vector<8x128xf32>
    %cst_48 = arith.constant dense<0x7F800000> : vector<8xf32>
    %139 = vector.multi_reduction <minimumf>, %138, %cst_48 [1] : vector<8x128xf32> to vector<8xf32>
    %140 = vector.shape_cast %139 : vector<8xf32> to vector<8x1xf32>
    %141 = arith.maximumf %131, %125 : vector<8x1xf32>
    %142 = arith.minimumf %140, %141 : vector<8x1xf32>
    %cst_49 = arith.constant 0.000000e+00 : f32
    %143 = vector.broadcast %cst_49 : f32 to vector<8x1xf32>
    %144 = arith.maximumf %142, %143 : vector<8x1xf32>
    %145 = vector.shape_cast %144 : vector<8x1xf32> to vector<8x1xf32>
    %146 = vector.broadcast %145 : vector<8x1xf32> to vector<8x128xf32>
    %c0_50 = arith.constant 0 : index
    %c0_51 = arith.constant 0 : index
    %147 = vector.load %arg4[%c0_50, %c0_51] : memref<8x128xf32, #tpu.memory_space<vmem>>, vector<8x128xf32>
    tpu.vector_store %arg4[%c0_50, %c0_51], %146 {strides = array<i32>} : memref<8x128xf32, #tpu.memory_space<vmem>>, vector<8x128xf32>,
    return
  }
  func.func @transform_0(%arg0: i32) -> (i32, i32) {
    %c0_i32 = arith.constant 0 : i32
    %c0_i32_0 = arith.constant 0 : i32
    return %arg0, %c0_i32 : i32, i32
  }
  func.func @transform_1(%arg0: i32) -> (i32, i32) {
    %c0_i32 = arith.constant 0 : i32
    %c0_i32_0 = arith.constant 0 : i32
    %c0_i32_1 = arith.constant 0 : i32
    return %c0_i32, %c0_i32_0 : i32, i32
  }
  func.func @transform_2(%arg0: i32) -> (i32, i32) {
    %c0_i32 = arith.constant 0 : i32
    %c0_i32_0 = arith.constant 0 : i32
    %c0_i32_1 = arith.constant 0 : i32
    return %c0_i32, %c0_i32_0 : i32, i32
  }
  func.func @transform_3(%arg0: i32) -> (i32, i32) {
    %c0_i32 = arith.constant 0 : i32
    %c0_i32_0 = arith.constant 0 : i32
    return %arg0, %c0_i32 : i32, i32
  }
}

</mosaic_0001>

<bundles_post_ra>
// kernel: tpu_custom_call.1
= control target key start
LH: loop header
LB: loop body
LE: loop exit
PB: predicated region body
PF: predicated region fallthrough
CT: control target
= control target key end

     0   :  { %8 = vsyncpa [#allocation3], 0  ;;  %s3294_s0 = inlined_call_operand.hbm [shape: f32[8,128], index: 0, kind: input, shape index: {}]   ;;  %s3295_s1 = inlined_call_operand.vmem [shape: f32[1,128], index: 1, kind: input, shape index: {}]   ;;  %s3296_s2 = inlined_call_operand.vmem [shape: f32[1,128], index: 2, kind: input, shape index: {}]   ;;  %s3297_s3 = inlined_call_operand.hbm [shape: f32[8,128], index: 3, kind: output, shape index: {}]  }
   0x1   :  { %9 = vsyncpa [#allocation4], 0  ;;  %s2295_s12 = smov [#allocation2]  }
   0x2   :  { %s16_s13 = sshll.u32 %s2295_s12, 4  ;;  %s17_s13 = int_to_ptr.vmem [resolvable:$true] %s16_s13 }
   0x3   :  { %s2259_s14 = scalar_lea.vmem %s17_s13, 128  ;;  %p2264_p1 = scmp.lt.s32.totalorder %s17_s13, %s17_s13 }
   0x4   :  { %p2260_p0 = scmp.ne.s32.totalorder %s17_s13, %s2259_s14  ;;  %p2265_p2 = scmp.lt.s32.totalorder %s2259_s14, %s2259_s14 }
   0x6   :  { %p2266_p3 = por %p2265_p2, %p2264_p1 }
   0x8   :  { %p2267_p4 = pnand %p2266_p3, %p2260_p0 }
   0xa   :  { %2270 = shalt.err (!%p2267_p4)
}
   0xb   :  { %19 = dma.hbm_to_vmem [thread:$0]  %s3294_s0, 128, %s17_s13, [#allocation3]   ;;  %v30_v0 = vlaneseq }
   0xc   :  { %2291 = dma.done.wait [#allocation3], 128  }
   0xd   :  { %2292 = vsyncadd [#allocation3], 4294967168  ;;  %v2296_v1 = vmov 0.0   ;;  %v2327_v2 = vand.u32 127, %v30_v0  ;;  %v2329_v3 = vshrl.u32 %v30_v0, 7  ;;  %vm3298_vm0 = vmmov 0  }
   0xe   :  { %1815 = vmatprep.subr.mxu0 %v2296_v1  ;;  %1850 = vmatprep.subr.mxu1 %v2296_v1  ;;  %v3319_v11 = vmov 0  ;;  %v3325_v14 = vmov 0  ;;  %v2298_v15 = vmov 1.0   ;;  %v2377_v20 = vld [vmem:[#allocation2] sm:$0xff]  ;;  %v3329_v22 = vmov 0 }
   0xf   :  { %3318 = vst [vmem:[#allocation8_spill] sm:$0xff] %v2327_v2  ;;  %1847 = vmatprep.mubr.msk.f32.mxu0 %vm3298_vm0, %v2296_v1  ;;  %1882 = vmatprep.mubr.msk.f32.mxu1 %vm3298_vm0, %v2296_v1  ;;  %v60_v4 = vadd.s32 120, %v2329_v3  ;;  %v59_v5 = vadd.s32 112, %v2329_v3  ;;  %v58_v6 = vadd.s32 104, %v2329_v3  ;;  %v57_v7 = vadd.s32 96, %v2329_v3 }
  0x10   :  { %v56_v8 = vadd.s32 88, %v2329_v3  ;;  %v55_v9 = vadd.s32 80, %v2329_v3  ;;  %v54_v10 = vadd.s32 72, %v2329_v3  ;;  %v53_v19 = vadd.s32 64, %v2329_v3  ;;  %40 = vadd.xlane.f32.xlu0 %v2377_v20 }
  0x11   :  { %vm2343_vm1 = vcmp.le.s32.totalorder %v60_v4, %v2327_v2  ;;  %vm2348_vm2 = vcmp.le.s32.totalorder %v59_v5, %v2327_v2  ;;  %vm2353_vm3 = vcmp.le.s32.totalorder %v58_v6, %v2327_v2  ;;  %vm2358_vm4 = vcmp.le.s32.totalorder %v57_v7, %v2327_v2 }
  0x12   :  { %v3320_v11 = vsel %vm2343_vm1, 4294967295, %v3319_v11  ;;  %v3326_v14 = vsel %vm2358_vm4, 4294967295, %v3325_v14  ;;  %1816 = vmatpush3.msk.msra.mxu0 %vm2343_vm1, %v2298_v15  ;;  %vm2366_vm5 = vcmp.le.s32.totalorder %v56_v8, %v2327_v2  ;;  %v1513_v17 = vsel %vm2343_vm1, 1.0, %v2296_v1 }
  0x13   :  { %v1512_v18 = vsel %vm2348_vm2, 1.0, %v2296_v1  ;;  %1817 = vmatprep.subr.mxu0 %v2296_v1  ;;  %v2380_v21 = vsub.f32 %v1513_v17, %v1513_v17  ;;  %vm2383_vm6 = vcmp.le.s32.totalorder %v55_v9, %v2327_v2  ;;  %v1511_v24 = vsel %vm2353_vm3, 1.0, %v2296_v1 }
  0x14   :  { %v3330_v22 = vsel %vm2383_vm6, 4294967295, %v3329_v22  ;;  %v2387_v23 = vsub.f32 %v1512_v18, %v1512_v18  ;;  %1818 = vmatpush3.msk.msra.mxu0 %vm2348_vm2, %v2298_v15  ;;  %vm2397_vm7 = vcmp.le.s32.totalorder %v54_v10, %v2327_v2  ;;  %v2401_v26 = vsub.f32 %v1511_v24, %v1511_v24 }
  0x15   :  { %v1510_v27 = vsel %vm2358_vm4, 1.0, %v2296_v1  ;;  %v52_v28 = vadd.s32 56, %v2329_v3  ;;  %1819 = vmatprep.subr.mxu0 %v2296_v1  ;;  %v2409_v29 = vand.u32 4294901760, %v2380_v21  ;;  %v1509_v32 = vsel %vm2366_vm5, 1.0, %v2296_v1 }
  0x16   :  { %v2412_v30 = vand.u32 4294901760, %v2387_v23  ;;  %v2414_v31 = vsub.f32 %v1510_v27, %v1510_v27  ;;  %1820 = vmatpush3.msk.msra.mxu0 %vm2353_vm3, %v2298_v15  ;;  %v2423_v33 = vand.u32 4294901760, %v2401_v26  ;;  %vm2426_vm8 = vcmp.le.s32.totalorder %v53_v19, %v2327_v2 }
  0x17   :  { %v2430_v35 = vsub.f32 %v1509_v32, %v1509_v32  ;;  %v51_v36 = vadd.s32 48, %v2329_v3  ;;  %1821 = vmatprep.subr.mxu0 %v2296_v1  ;;  %v204_v37 = vsub.f32 %v2380_v21, %v2409_v29  ;;  %v1508_v40 = vsel %vm2383_vm6, 1.0, %v2296_v1 }
  0x18   :  { %v211_v38 = vsub.f32 %v2387_v23, %v2412_v30  ;;  %v2439_v39 = vand.u32 4294901760, %v2414_v31  ;;  %1822 = vmatpush3.msk.msra.mxu0 %vm2358_vm4, %v2298_v15  ;;  %v218_v41 = vsub.f32 %v2401_v26, %v2423_v33  ;;  %vm2450_vm9 = vcmp.le.s32.totalorder %v52_v28, %v2327_v2 }
  0x19   :  { %v3335_v42 = vmov 0  ;;  %v2455_v43 = vand.u32 4294901760, %v2430_v35  ;;  %v2457_v44 = vsub.f32 %v1508_v40, %v1508_v40  ;;  %1823 = vmatprep.subr.mxu0 %v2296_v1  ;;  %v2460_v45 = vand.u32 4294901760, %v204_v37 }
  0x1a   :  { %v3336_v42 = vsel %vm2450_vm9, 4294967295, %v3335_v42  ;;  %v2462_v46 = vand.u32 4294901760, %v211_v38  ;;  %v225_v47 = vsub.f32 %v2414_v31, %v2439_v39  ;;  %v50_v48 = vadd.s32 40, %v2329_v3  ;;  %1824 = vmatpush3.msk.msra.mxu0 %vm2366_vm5, %v2298_v15 }
  0x1b   :  { %v232_v49 = vsub.f32 %v2430_v35, %v2455_v43  ;;  %vm2473_vm10 = vcmp.le.s32.totalorder %v51_v36, %v2327_v2  ;;  %v2478_v51 = vand.u32 4294901760, %v2457_v44  ;;  %v1507_v52 = vsel %vm2397_vm7, 1.0, %v2296_v1  ;;  %1825 = vmatprep.subr.mxu0 %v2296_v1  ;;  %1851 = vmatpush3.msra.mxu1 %v2460_v45 }
  0x1c   :  { %v2485_v53 = vand.u32 4294901760, %v218_v41  ;;  %v2487_v54 = vand.u32 4294901760, %v225_v47  ;;  %v2489_v55 = vsub.f32 %v1507_v52, %v1507_v52  ;;  %v49_v56 = vadd.s32 32, %v2329_v3  ;;  %1826 = vmatpush3.msk.msra.mxu0 %vm2383_vm6, %v2298_v15  ;;  %1852 = vmatprep.subr.mxu1 %v2296_v1 }
  0x1d   :  { %v239_v57 = vsub.f32 %v2457_v44, %v2478_v51  ;;  %vm2499_vm11 = vcmp.le.s32.totalorder %v50_v48, %v2327_v2  ;;  %v1506_v59 = vsel %vm2426_vm8, 1.0, %v2296_v1  ;;  %v48_v60 = vadd.s32 24, %v2329_v3  ;;  %1827 = vmatprep.subr.mxu0 %v2296_v1  ;;  %1853 = vmatpush3.msra.mxu1 %v2462_v46 }
  0x1e   :  { %3339 = vst [vmem:[#allocation9_spill] sm:$0xff] %v2487_v54  ;;  %v2509_v61 = vand.u32 4294901760, %v232_v49  ;;  %v2512_v62 = vand.u32 4294901760, %v2489_v55  ;;  %v2514_v63 = vsub.f32 %v1506_v59, %v1506_v59  ;;  %v1505_v0 = vsel %vm2450_vm9, 1.0, %v2296_v1  ;;  %1828 = vmatpush3.msk.msra.mxu0 %vm2397_vm7, %v2298_v15  ;;  %1854 = vmatprep.subr.mxu1 %v2296_v1 }
  0x1f   :  { %v2523_v4 = vand.u32 4294901760, %v239_v57  ;;  %vm2526_vm12 = vcmp.le.s32.totalorder %v49_v56, %v2327_v2  ;;  %v2530_v6 = vsub.f32 %v1505_v0, %v1505_v0  ;;  %v47_v7 = vadd.s32 16, %v2329_v3  ;;  %1829 = vmatprep.subr.mxu0 %v2296_v1  ;;  %1855 = vmatpush3.msra.mxu1 %v2485_v53 }
  0x20   :  { %3342 = vst [vmem:[#allocation10_spill] sm:$0xff] %v2509_v61  ;;  %v246_v8 = vsub.f32 %v2489_v55, %v2512_v62  ;;  %v2538_v9 = vand.u32 4294901760, %v2514_v63  ;;  %v1504_v10 = vsel %vm2473_vm10, 1.0, %v2296_v1  ;;  %v46_v17 = vadd.s32 8, %v2329_v3  ;;  %1830 = vmatpush3.msk.msra.mxu0 %vm2426_vm8, %v2298_v15  ;;  %1856 = vmatprep.subr.mxu1 %v2296_v1 }
  0x21   :  { %3343 = vst [vmem:[#allocation11_spill] sm:$0xff] %v2523_v4  ;;  %vm2549_vm13 = vcmp.le.s32.totalorder %v48_v60, %v2327_v2  ;;  %v2554_v19 = vand.u32 4294901760, %v2530_v6  ;;  %v2556_v24 = vsub.f32 %v1504_v10, %v1504_v10  ;;  %v1503_v27 = vsel %vm2499_vm11, 1.0, %v2296_v1  ;;  %1831 = vmatprep.subr.mxu0 %v2296_v1  ;;  %1857 = vmatpush3.msra.mxu1 %v2487_v54 }
  0x22   :  { %v2563_v28 = vand.u32 4294901760, %v246_v8  ;;  %v253_v32 = vsub.f32 %v2514_v63, %v2538_v9  ;;  %vm2568_vm14 = vcmp.le.s32.totalorder %v47_v7, %v2327_v2  ;;  %v2572_v37 = vsub.f32 %v1503_v27, %v1503_v27  ;;  %1832 = vmatpush3.msk.msra.mxu0 %vm2450_vm9, %v2298_v15  ;;  %1858 = vmatprep.subr.mxu1 %v2296_v1 }
  0x23   :  { %v260_v38 = vsub.f32 %v2530_v6, %v2554_v19  ;;  %v2581_v40 = vand.u32 4294901760, %v2556_v24  ;;  %vm2584_vm15 = vcmp.le.s32.totalorder %v46_v17, %v2327_v2  ;;  %v3351_v41 = vmov 0  ;;  %1833 = vmatprep.subr.mxu0 %v2296_v1  ;;  %1859 = vmatpush3.msra.mxu1 %v2509_v61 }
  0x24   :  { %3348 = vst [vmem:[#allocation12_spill] sm:$0xff] %v2563_v28  ;;  %v3352_v41 = vsel %vm2584_vm15, 4294967295, %v3351_v41  ;;  %v1502_v47 = vsel %vm2526_vm12, 1.0, %v2296_v1  ;;  %v2594_v48 = vand.u32 4294901760, %v2572_v37  ;;  %vm2598_vm0 = vcmp.le.s32.totalorder %v2329_v3, %v2327_v2  ;;  %1834 = vmatpush3.msk.msra.mxu0 %vm2473_vm10, %v2298_v15  ;;  %1860 = vmatprep.subr.mxu1 %v2296_v1 }
  0x25   :  { %v2602_v52 = vsub.f32 %v1502_v47, %v1502_v47  ;;  %v2605_v56 = vand.u32 4294901760, %v2377_v20  ;;  %v2611_v57 = vand.u32 4294901760, %v253_v32  ;;  %v1501_v3 = vsel %vm2549_vm13, 1.0, %v2296_v1  ;;  %1835 = vmatprep.subr.mxu0 %v2296_v1  ;;  %1861 = vmatpush3.msra.mxu1 %v2523_v4 }
  0x26   :  { %v1500_v59 = vsel %vm2568_vm14, 1.0, %v2296_v1  ;;  %v267_v60 = vsub.f32 %v2556_v24, %v2581_v40  ;;  %v2630_v8 = vsub.f32 %v1501_v3, %v1501_v3  ;;  %1836 = vmatpush3.msk.msra.mxu0 %vm2499_vm11, %v2298_v15  ;;  %1862 = vmatprep.subr.mxu1 %v2296_v1  ;;  %v1499_v17 = vsel %vm2584_vm15, 1.0, %v2296_v1 }
  0x27   :  { %3355 = vst [vmem:[#allocation13_spill] sm:$0xff] %v2611_v57  ;;  %v2624_v0 = vand.u32 4294901760, %v2602_v52  ;;  %v2628_v7 = vsub.f32 %v2377_v20, %v2605_v56  ;;  %v2636_v10 = vsub.f32 %v1500_v59, %v1500_v59  ;;  %v1498_v27 = vsel %vm2598_vm0, 1.0, %v2296_v1  ;;  %1837 = vmatprep.subr.mxu0 %v2296_v1  ;;  %1863 = vmatpush3.msra.mxu1 %v2563_v28 }
  0x28   :  { %v2646_v32 = vand.u32 4294901760, %v260_v38  ;;  %v274_v47 = vsub.f32 %v2572_v37, %v2594_v48  ;;  %v2652_v59 = vand.u32 4294901760, %v2630_v8  ;;  %1838 = vmatpush3.msk.msra.mxu0 %vm2526_vm12, %v2298_v15  ;;  %1864 = vmatprep.subr.mxu1 %v2296_v1  ;;  %v2658_v2 = vsub.f32 %v1499_v17, %v1499_v17 }
  0x29   :  { %1839 = vmatprep.subr.mxu0 %v2296_v1  ;;  %1865 = vmatpush3.msra.mxu1 %v2611_v57  ;;  %v2662_v38 = vand.u32 4294901760, %v267_v60  ;;  %v281_v3 = vsub.f32 %v2602_v52, %v2624_v0  ;;  %v2667_v28 = vand.u32 4294901760, %v2636_v10  ;;  %v2669_v4 = vsub.f32 %v1498_v27, %v1498_v27 }
  0x2a   :  { %3356 = vst [vmem:[#allocation14_spill] sm:$0xff] %v2646_v32  ;;  %1840 = vmatpush3.msk.msra.mxu0 %vm2549_vm13, %v2298_v15  ;;  %1866 = vmatprep.subr.mxu1 %v2296_v1  ;;  %v3358_v17 = vand.u32 4294901760, %v2628_v7  ;;  %v2680_v60 = vand.u32 4294901760, %v274_v47  ;;  %v288_v27 = vsub.f32 %v2630_v8, %v2652_v59  ;;  %v2685_v61 = vand.u32 4294901760, %v2658_v2 }
  0x2b   :  { %3357 = vst [vmem:[#allocation15_spill] sm:$0xff] %v2662_v38  ;;  %1841 = vmatprep.subr.mxu0 %v2296_v1  ;;  %1867 = vmatpush3.msra.mxu1 %v2646_v32  ;;  %v295_v47 = vsub.f32 %v2636_v10, %v2667_v28  ;;  %v2698_v32 = vand.u32 4294901760, %v2669_v4 }
  0x2c   :  { %v193_v57 = vsub.f32 %v2628_v7, %v3358_v17  ;;  %3359 = vst [vmem:[#allocation16_spill] sm:$0xff] %v2680_v60  ;;  %1842 = vmatpush3.msk.msra.mxu0 %vm2568_vm14, %v2298_v15  ;;  %1868 = vmatprep.subr.mxu1 %v2296_v1  ;;  %v2693_v17 = vand.u32 4294901760, %v281_v3  ;;  %v302_v3 = vsub.f32 %v2658_v2, %v2685_v61 }
  0x2d   :  { %1843 = vmatprep.subr.mxu0 %v2296_v1  ;;  %1869 = vmatpush3.msra.mxu1 %v2662_v38  ;;  %v2706_v38 = vand.u32 4294901760, %v288_v27 }
  0x2e   :  { %1844 = vmatpush3.msk.msra.mxu0 %vm2584_vm15, %v2298_v15  ;;  %1870 = vmatprep.subr.mxu1 %v2296_v1  ;;  %v194_v54 = vand.u32 4294901760, %v193_v57  ;;  %v2716_v57 = vand.u32 4294901760, %v295_v47  ;;  %v2723_v27 = vand.u32 4294901760, %v302_v3 }
  0x2f   :  { %1845 = vmatprep.subr.mxu0 %v2296_v1  ;;  %1871 = vmatpush3.msra.mxu1 %v2680_v60  ;;  %v309_v60 = vsub.f32 %v2669_v4, %v2698_v32 }
  0x30   :  { %1846 = vmatpush3.msk.msra.mxu0 %vm2598_vm0, %v2298_v15  ;;  %1872 = vmatprep.subr.mxu1 %v2296_v1 }
  0x31   :  { %1873 = vmatpush3.msra.mxu1 %v2693_v17  ;;  %1885 = vmatprep.subr.mxu0 %v2296_v1  ;;  %v2729_v47 = vand.u32 4294901760, %v309_v60 }
  0x32   :  { %1848 = vmatmul.mubr.f32.vlgmr.msra.gmra.mxu0 %v194_v54  ;;  %1874 = vmatprep.subr.mxu1 %v2296_v1  ;;  %v3361_v54 = vand.u32 4294901760, %v2628_v7 }
  0x33   :  { %1886 = vmatpush3.msra.mxu0 %v2380_v21  ;;  %1875 = vmatpush3.msra.mxu1 %v2706_v38 }
  0x34   :  { %1887 = vmatprep.subr.mxu0 %v2296_v1  ;;  %1876 = vmatprep.subr.mxu1 %v2296_v1 }
  0x35   :  { %1888 = vmatpush3.msra.mxu0 %v2387_v23  ;;  %1877 = vmatpush3.msra.mxu1 %v2716_v57 }
  0x36   :  { %1889 = vmatprep.subr.mxu0 %v2296_v1  ;;  %1878 = vmatprep.subr.mxu1 %v2296_v1 }
  0x37   :  { %1890 = vmatpush3.msra.mxu0 %v2401_v26  ;;  %1879 = vmatpush3.msra.mxu1 %v2723_v27 }
  0x38   :  { %1891 = vmatprep.subr.mxu0 %v2296_v1  ;;  %1880 = vmatprep.subr.mxu1 %v2296_v1 }
  0x39   :  { %1892 = vmatpush3.msra.mxu0 %v2414_v31  ;;  %1881 = vmatpush3.msra.mxu1 %v2729_v47 }
  0x3a   :  { %1893 = vmatprep.subr.mxu0 %v2296_v1  ;;  %1883 = vmatmul.mubr.f32.vlgmr.msra.gmra.mxu1 %v2605_v56 }
  0x3b   :  { %1894 = vmatpush3.msra.mxu0 %v2430_v35  ;;  %1920 = vmatprep.subr.mxu1 %v2296_v1 }
  0x3c   :  { %1895 = vmatprep.subr.mxu0 %v2296_v1  ;;  %1921 = vmatpush3.msk.msra.mxu1 %vm2343_vm1, %v2298_v15 }
  0x3d   :  { %1896 = vmatpush3.msra.mxu0 %v2457_v44  ;;  %1922 = vmatprep.subr.mxu1 %v2296_v1 }
  0x3e   :  { %1897 = vmatprep.subr.mxu0 %v2296_v1  ;;  %1923 = vmatpush3.msk.msra.mxu1 %vm2348_vm2, %v2298_v15 }
  0x3f   :  { %1898 = vmatpush3.msra.mxu0 %v2489_v55  ;;  %1924 = vmatprep.subr.mxu1 %v2296_v1 }
  0x40   :  { %1899 = vmatprep.subr.mxu0 %v2296_v1  ;;  %1925 = vmatpush3.msk.msra.mxu1 %vm2353_vm3, %v2298_v15 }
  0x41   :  { %1900 = vmatpush3.msra.mxu0 %v2514_v63  ;;  %1926 = vmatprep.subr.mxu1 %v2296_v1 }
  0x42   :  { %1901 = vmatprep.subr.mxu0 %v2296_v1  ;;  %1927 = vmatpush3.msk.msra.mxu1 %vm2358_vm4, %v2298_v15 }
  0x43   :  { %1902 = vmatpush3.msra.mxu0 %v2530_v6  ;;  %1928 = vmatprep.subr.mxu1 %v2296_v1 }
  0x44   :  { %1903 = vmatprep.subr.mxu0 %v2296_v1  ;;  %1929 = vmatpush3.msk.msra.mxu1 %vm2366_vm5, %v2298_v15 }
  0x45   :  { %1904 = vmatpush3.msra.mxu0 %v2556_v24  ;;  %1930 = vmatprep.subr.mxu1 %v2296_v1 }
  0x46   :  { %1905 = vmatprep.subr.mxu0 %v2296_v1  ;;  %1931 = vmatpush3.msk.msra.mxu1 %vm2383_vm6, %v2298_v15 }
  0x47   :  { %1906 = vmatpush3.msra.mxu0 %v2572_v37  ;;  %1932 = vmatprep.subr.mxu1 %v2296_v1 }
  0x48   :  { %1907 = vmatprep.subr.mxu0 %v2296_v1  ;;  %1933 = vmatpush3.msk.msra.mxu1 %vm2397_vm7, %v2298_v15 }
  0x49   :  { %1908 = vmatpush3.msra.mxu0 %v2602_v52  ;;  %1934 = vmatprep.subr.mxu1 %v2296_v1 }
  0x4a   :  { %1909 = vmatprep.subr.mxu0 %v2296_v1  ;;  %1935 = vmatpush3.msk.msra.mxu1 %vm2426_vm8, %v2298_v15 }
  0x4b   :  { %1910 = vmatpush3.msra.mxu0 %v2630_v8  ;;  %1936 = vmatprep.subr.mxu1 %v2296_v1 }
  0x4c   :  { %1911 = vmatprep.subr.mxu0 %v2296_v1  ;;  %1937 = vmatpush3.msk.msra.mxu1 %vm2450_vm9, %v2298_v15  ;;  %vm3360_vm9 = vmmov 0  }
  0x4d   :  { %1912 = vmatpush3.msra.mxu0 %v2636_v10  ;;  %1938 = vmatprep.subr.mxu1 %v2296_v1 }
  0x4e   :  { %1913 = vmatprep.subr.mxu0 %v2296_v1  ;;  %1939 = vmatpush3.msk.msra.mxu1 %vm2473_vm10, %v2298_v15 }
  0x4f   :  { %1914 = vmatpush3.msra.mxu0 %v2658_v2  ;;  %1940 = vmatprep.subr.mxu1 %v2296_v1 }
  0x50   :  { %1915 = vmatprep.subr.mxu0 %v2296_v1  ;;  %1941 = vmatpush3.msk.msra.mxu1 %vm2499_vm11, %v2298_v15 }
  0x51   :  { %1916 = vmatpush3.msra.mxu0 %v2669_v4  ;;  %1917 = vmatprep.mubr.msk.f32.mxu0 %vm3360_vm9, %v2296_v1 }
  0x52   :  { %1942 = vmatprep.subr.mxu1 %v2296_v1  ;;  %1918 = vmatmul.mubr.f32.vlgmr.msra.gmra.mxu0 %v2628_v7  ;;  %v2950_v7 = vld [vmem:[%s3295_s1] ss:$0 sm:$0xff] }
  0x53   :  { %1943 = vmatpush3.msk.msra.mxu1 %vm2526_vm12, %v2298_v15  ;;  %1955 = vmatprep.subr.mxu0 %v2296_v1  ;;  %v2965_v60 = vmul.f32 %v2950_v7, %v2377_v20 }
  0x54   :  { %1944 = vmatprep.subr.mxu1 %v2296_v1  ;;  %1956 = vmatpush3.msra.mxu0 %v2409_v29 }
  0x55   :  { %1945 = vmatpush3.msk.msra.mxu1 %vm2549_vm13, %v2298_v15  ;;  %1957 = vmatprep.subr.mxu0 %v2296_v1  ;;  %v2980_v20 = vand.u32 4294901760, %v2965_v60 }
  0x56   :  { %1946 = vmatprep.subr.mxu1 %v2296_v1  ;;  %1958 = vmatpush3.msra.mxu0 %v2412_v30 }
  0x57   :  { %1947 = vmatpush3.msk.msra.mxu1 %vm2568_vm14, %v2298_v15  ;;  %1959 = vmatprep.subr.mxu0 %v2296_v1 }
  0x58   :  { %1948 = vmatprep.subr.mxu1 %v2296_v1  ;;  %1960 = vmatpush3.msra.mxu0 %v2423_v33 }
  0x59   :  { %1949 = vmatpush3.msk.msra.mxu1 %vm2584_vm15, %v2298_v15  ;;  %1961 = vmatprep.subr.mxu0 %v2296_v1 }
  0x5a   :  { %1950 = vmatprep.subr.mxu1 %v2296_v1  ;;  %1962 = vmatpush3.msra.mxu0 %v2439_v39 }
  0x5b   :  { %1951 = vmatpush3.msk.msra.mxu1 %vm2598_vm0, %v2298_v15  ;;  %1952 = vmatprep.mubr.msk.f32.mxu1 %vm3360_vm9, %v2296_v1 }
  0x5c   :  { %1963 = vmatprep.subr.mxu0 %v2296_v1  ;;  %1953 = vmatmul.mubr.f32.vlgmr.msra.gmra.mxu1 %v3361_v54  ;;  %v3367_v54 = vld [vmem:[#allocation12_spill] sm:$0xff] }
  0x5d   :  { %1964 = vmatpush3.msra.mxu0 %v2455_v43  ;;  %1990 = vmatprep.subr.mxu1 %v2296_v1 }
  0x5e   :  { %1965 = vmatprep.subr.mxu0 %v2296_v1  ;;  %1991 = vmatpush3.msk.msra.mxu1 %vm2343_vm1, %v2298_v15 }
  0x5f   :  { %1966 = vmatpush3.msra.mxu0 %v2478_v51  ;;  %1992 = vmatprep.subr.mxu1 %v2296_v1 }
  0x60   :  { %1967 = vmatprep.subr.mxu0 %v2296_v1  ;;  %1993 = vmatpush3.msk.msra.mxu1 %vm2348_vm2, %v2298_v15 }
  0x61   :  { %1968 = vmatpush3.msra.mxu0 %v2512_v62  ;;  %1994 = vmatprep.subr.mxu1 %v2296_v1 }
  0x62   :  { %1969 = vmatprep.subr.mxu0 %v2296_v1  ;;  %1995 = vmatpush3.msk.msra.mxu1 %vm2353_vm3, %v2298_v15 }
  0x63   :  { %1970 = vmatpush3.msra.mxu0 %v2538_v9  ;;  %1996 = vmatprep.subr.mxu1 %v2296_v1 }
  0x64   :  { %1971 = vmatprep.subr.mxu0 %v2296_v1  ;;  %1997 = vmatpush3.msk.msra.mxu1 %vm2358_vm4, %v2298_v15 }
  0x65   :  { %1972 = vmatpush3.msra.mxu0 %v2554_v19  ;;  %1998 = vmatprep.subr.mxu1 %v2296_v1 }
  0x66   :  { %1973 = vmatprep.subr.mxu0 %v2296_v1  ;;  %1999 = vmatpush3.msk.msra.mxu1 %vm2366_vm5, %v2298_v15 }
  0x67   :  { %1974 = vmatpush3.msra.mxu0 %v2581_v40  ;;  %2000 = vmatprep.subr.mxu1 %v2296_v1 }
  0x68   :  { %1975 = vmatprep.subr.mxu0 %v2296_v1  ;;  %2001 = vmatpush3.msk.msra.mxu1 %vm2383_vm6, %v2298_v15  ;;  %vm3362_vm6 = vnez %v3336_v42 }
  0x69   :  { %1976 = vmatpush3.msra.mxu0 %v2594_v48  ;;  %2002 = vmatprep.subr.mxu1 %v2296_v1 }
  0x6a   :  { %1977 = vmatprep.subr.mxu0 %v2296_v1  ;;  %2003 = vmatpush3.msk.msra.mxu1 %vm2397_vm7, %v2298_v15 }
  0x6b   :  { %1978 = vmatpush3.msra.mxu0 %v2624_v0  ;;  %2004 = vmatprep.subr.mxu1 %v2296_v1 }
  0x6c   :  { %1979 = vmatprep.subr.mxu0 %v2296_v1  ;;  %2005 = vmatpush3.msk.msra.mxu1 %vm2426_vm8, %v2298_v15 }
  0x6d   :  { %1980 = vmatpush3.msra.mxu0 %v2652_v59  ;;  %2006 = vmatprep.subr.mxu1 %v2296_v1 }
  0x6e   :  { %1981 = vmatprep.subr.mxu0 %v2296_v1  ;;  %2007 = vmatpush3.msk.msra.mxu1 %vm3362_vm6, %v2298_v15 }
  0x6f   :  { %1982 = vmatpush3.msra.mxu0 %v2667_v28  ;;  %2008 = vmatprep.subr.mxu1 %v2296_v1 }
  0x70   :  { %1983 = vmatprep.subr.mxu0 %v2296_v1  ;;  %2009 = vmatpush3.msk.msra.mxu1 %vm2473_vm10, %v2298_v15 }
  0x71   :  { %1984 = vmatpush3.msra.mxu0 %v2685_v61  ;;  %2010 = vmatprep.subr.mxu1 %v2296_v1 }
  0x72   :  { %1985 = vmatprep.subr.mxu0 %v2296_v1  ;;  %2011 = vmatpush3.msk.msra.mxu1 %vm2499_vm11, %v2298_v15 }
  0x73   :  { %1986 = vmatpush3.msra.mxu0 %v2698_v32  ;;  %1987 = vmatprep.mubr.msk.f32.mxu0 %vm3360_vm9, %v2296_v1 }
  0x74   :  { %2012 = vmatprep.subr.mxu1 %v2296_v1  ;;  %1988 = vmatmul.mubr.f32.vlgmr.msra.gmra.mxu0 %v2605_v56 }
  0x75   :  { %2013 = vmatpush3.msk.msra.mxu1 %vm2526_vm12, %v2298_v15  ;;  %2025 = vmatprep.subr.mxu0 %v2296_v1 }
  0x76   :  { %2014 = vmatprep.subr.mxu1 %v2296_v1  ;;  %2026 = vmatpush3.msk.msra.mxu0 %vm2343_vm1, %v2298_v15 }
  0x77   :  { %2015 = vmatpush3.msk.msra.mxu1 %vm2549_vm13, %v2298_v15  ;;  %2027 = vmatprep.subr.mxu0 %v2296_v1 }
  0x78   :  { %2016 = vmatprep.subr.mxu1 %v2296_v1  ;;  %2028 = vmatpush3.msk.msra.mxu0 %vm2348_vm2, %v2298_v15 }
  0x79   :  { %2017 = vmatpush3.msk.msra.mxu1 %vm2568_vm14, %v2298_v15  ;;  %2029 = vmatprep.subr.mxu0 %v2296_v1 }
  0x7a   :  { %2018 = vmatprep.subr.mxu1 %v2296_v1  ;;  %2030 = vmatpush3.msk.msra.mxu0 %vm2353_vm3, %v2298_v15 }
  0x7b   :  { %2019 = vmatpush3.msk.msra.mxu1 %vm2584_vm15, %v2298_v15  ;;  %2031 = vmatprep.subr.mxu0 %v2296_v1 }
  0x7c   :  { %2020 = vmatprep.subr.mxu1 %v2296_v1  ;;  %2032 = vmatpush3.msk.msra.mxu0 %vm2358_vm4, %v2298_v15  ;;  %vm3363_vm4 = vnez %v3330_v22 }
  0x7d   :  { %2021 = vmatpush3.msk.msra.mxu1 %vm2598_vm0, %v2298_v15  ;;  %2022 = vmatprep.mubr.msk.f32.mxu1 %vm3360_vm9, %v2296_v1 }
  0x7e   :  { %2033 = vmatprep.subr.mxu0 %v2296_v1  ;;  %2023 = vmatmul.mubr.f32.vlgmr.msra.gmra.mxu1 %v2605_v56  ;;  %v3366_v56 = vld [vmem:[#allocation11_spill] sm:$0xff] }
  0x7f   :  { %2034 = vmatpush3.msk.msra.mxu0 %vm2366_vm5, %v2298_v15  ;;  %2060 = vmatprep.subr.mxu1 %v2296_v1 }
  0x80   :  { %2035 = vmatprep.subr.mxu0 %v2296_v1  ;;  %2061 = vmatpush3.msra.mxu1 %v2460_v45  ;;  %v3364_v45 = vld [vmem:[#allocation9_spill] sm:$0xff] }
  0x81   :  { %2036 = vmatpush3.msk.msra.mxu0 %vm3363_vm4, %v2298_v15  ;;  %2062 = vmatprep.subr.mxu1 %v2296_v1 }
  0x82   :  { %2037 = vmatprep.subr.mxu0 %v2296_v1  ;;  %2063 = vmatpush3.msra.mxu1 %v2462_v46  ;;  %v2996_v46 = vsub.f32 %v2965_v60, %v2980_v20 }
  0x83   :  { %2038 = vmatpush3.msk.msra.mxu0 %vm2397_vm7, %v2298_v15  ;;  %2064 = vmatprep.subr.mxu1 %v2296_v1 }
  0x84   :  { %2039 = vmatprep.subr.mxu0 %v2296_v1  ;;  %2065 = vmatpush3.msra.mxu1 %v2485_v53  ;;  %v3365_v53 = vld [vmem:[#allocation10_spill] sm:$0xff]  ;;  %v833_v3 = vand.u32 4294901760, %v2996_v46 }
  0x85   :  { %2040 = vmatpush3.msk.msra.mxu0 %vm2426_vm8, %v2298_v15  ;;  %2066 = vmatprep.subr.mxu1 %v2296_v1 }
  0x86   :  { %2041 = vmatprep.subr.mxu0 %v2296_v1  ;;  %2067 = vmatpush3.msra.mxu1 %v3364_v45  ;;  %v3368_v45 = vld [vmem:[#allocation13_spill] sm:$0xff] }
  0x87   :  { %2042 = vmatpush3.msk.msra.mxu0 %vm3362_vm6, %v2298_v15  ;;  %2068 = vmatprep.subr.mxu1 %v2296_v1 }
  0x88   :  { %2043 = vmatprep.subr.mxu0 %v2296_v1  ;;  %2069 = vmatpush3.msra.mxu1 %v3365_v53  ;;  %v834_v53 = vsub.f32 %v2996_v46, %v833_v3 }
  0x89   :  { %2044 = vmatpush3.msk.msra.mxu0 %vm2473_vm10, %v2298_v15  ;;  %2070 = vmatprep.subr.mxu1 %v2296_v1 }
  0x8a   :  { %2045 = vmatprep.subr.mxu0 %v2296_v1  ;;  %2071 = vmatpush3.msra.mxu1 %v3366_v56  ;;  %v3369_v56 = vld [vmem:[#allocation14_spill] sm:$0xff] }
  0x8b   :  { %2046 = vmatpush3.msk.msra.mxu0 %vm2499_vm11, %v2298_v15  ;;  %2072 = vmatprep.subr.mxu1 %v2296_v1 }
  0x8c   :  { %2047 = vmatprep.subr.mxu0 %v2296_v1  ;;  %2073 = vmatpush3.msra.mxu1 %v3367_v54  ;;  %v3370_v54 = vld [vmem:[#allocation15_spill] sm:$0xff] }
  0x8d   :  { %2048 = vmatpush3.msk.msra.mxu0 %vm2526_vm12, %v2298_v15  ;;  %2074 = vmatprep.subr.mxu1 %v2296_v1 }
  0x8e   :  { %2049 = vmatprep.subr.mxu0 %v2296_v1  ;;  %2075 = vmatpush3.msra.mxu1 %v3368_v45  ;;  %v835_v45 = vand.u32 4294901760, %v834_v53 }
  0x8f   :  { %2050 = vmatpush3.msk.msra.mxu0 %vm2549_vm13, %v2298_v15  ;;  %2076 = vmatprep.subr.mxu1 %v2296_v1 }
  0x90   :  { %2051 = vmatprep.subr.mxu0 %v2296_v1  ;;  %2077 = vmatpush3.msra.mxu1 %v3369_v56  ;;  %v3371_v56 = vld [vmem:[#allocation16_spill] sm:$0xff] }
  0x91   :  { %2052 = vmatpush3.msk.msra.mxu0 %vm2568_vm14, %v2298_v15  ;;  %2078 = vmatprep.subr.mxu1 %v2296_v1 }
  0x92   :  { %2053 = vmatprep.subr.mxu0 %v2296_v1  ;;  %2079 = vmatpush3.msra.mxu1 %v3370_v54 }
  0x93   :  { %2054 = vmatpush3.msk.msra.mxu0 %vm2584_vm15, %v2298_v15  ;;  %2080 = vmatprep.subr.mxu1 %v2296_v1 }
  0x94   :  { %2055 = vmatprep.subr.mxu0 %v2296_v1  ;;  %2081 = vmatpush3.msra.mxu1 %v3371_v56 }
  0x95   :  { %2056 = vmatpush3.msk.msra.mxu0 %vm2598_vm0, %v2298_v15  ;;  %2082 = vmatprep.subr.mxu1 %v2296_v1 }
  0x96   :  { %2057 = vmatprep.mubr.msk.f32.mxu0 %vm3360_vm9, %v2296_v1  ;;  %2083 = vmatpush3.msra.mxu1 %v2693_v17 }
  0x97   :  { %2095 = vmatprep.subr.mxu0 %v2296_v1  ;;  %2058 = vmatmul.mubr.f32.vlgmr.msra.gmra.mxu0 %v835_v45  ;;  %v2299_v45 = vmov 0  }
  0x98   :  { %2084 = vmatprep.subr.mxu1 %v2296_v1  ;;  %2096 = vmatpush3.msra.mxu0 %v2380_v21 }
  0x99   :  { %2085 = vmatpush3.msra.mxu1 %v2706_v38  ;;  %2097 = vmatprep.subr.mxu0 %v2296_v1 }
  0x9a   :  { %2086 = vmatprep.subr.mxu1 %v2296_v1  ;;  %2098 = vmatpush3.msra.mxu0 %v2387_v23 }
  0x9b   :  { %2087 = vmatpush3.msra.mxu1 %v2716_v57  ;;  %2099 = vmatprep.subr.mxu0 %v2296_v1 }
  0x9c   :  { %2088 = vmatprep.subr.mxu1 %v2296_v1  ;;  %2100 = vmatpush3.msra.mxu0 %v2401_v26 }
  0x9d   :  { %2089 = vmatpush3.msra.mxu1 %v2723_v27  ;;  %2101 = vmatprep.subr.mxu0 %v2296_v1 }
  0x9e   :  { %2090 = vmatprep.subr.mxu1 %v2296_v1  ;;  %2102 = vmatpush3.msra.mxu0 %v2414_v31 }
  0x9f   :  { %2091 = vmatpush3.msra.mxu1 %v2729_v47  ;;  %2092 = vmatprep.mubr.msk.f32.mxu1 %vm3360_vm9, %v2296_v1 }
  0xa0   :  { %2103 = vmatprep.subr.mxu0 %v2296_v1  ;;  %2093 = vmatmul.mubr.f32.vlgmr.msra.gmra.mxu1 %v2980_v20 }
  0xa1   :  { %2104 = vmatpush3.msra.mxu0 %v2430_v35  ;;  %2130 = vmatprep.subr.mxu1 %v2296_v1 }
  0xa2   :  { %2105 = vmatprep.subr.mxu0 %v2296_v1  ;;  %2131 = vmatpush3.msk.msra.mxu1 %vm2343_vm1, %v2298_v15  ;;  %vm3372_vm1 = vnez %v3326_v14 }
  0xa3   :  { %2106 = vmatpush3.msra.mxu0 %v2457_v44  ;;  %2132 = vmatprep.subr.mxu1 %v2296_v1 }
  0xa4   :  { %2107 = vmatprep.subr.mxu0 %v2296_v1  ;;  %2133 = vmatpush3.msk.msra.mxu1 %vm2348_vm2, %v2298_v15 }
  0xa5   :  { %2108 = vmatpush3.msra.mxu0 %v2489_v55  ;;  %2134 = vmatprep.subr.mxu1 %v2296_v1  ;;  %v3264_v55 = vpop.xlane.xlu0 %40 }
  0xa6   :  { %2109 = vmatprep.subr.mxu0 %v2296_v1  ;;  %2135 = vmatpush3.msk.msra.mxu1 %vm2353_vm3, %v2298_v15  ;;  %v1429_v56 = vmul.f32 14.0, %v3264_v55 }
  0xa7   :  { %2110 = vmatpush3.msra.mxu0 %v2514_v63  ;;  %2136 = vmatprep.subr.mxu1 %v2296_v1 }
  0xa8   :  { %2111 = vmatprep.subr.mxu0 %v2296_v1  ;;  %2137 = vmatpush3.msk.msra.mxu1 %vm3372_vm1, %v2298_v15 }
  0xa9   :  { %2112 = vmatpush3.msra.mxu0 %v2530_v6  ;;  %2138 = vmatprep.subr.mxu1 %v2296_v1 }
  0xaa   :  { %2113 = vmatprep.subr.mxu0 %v2296_v1  ;;  %2139 = vmatpush3.msk.msra.mxu1 %vm2366_vm5, %v2298_v15 }
  0xab   :  { %2114 = vmatpush3.msra.mxu0 %v2556_v24  ;;  %2140 = vmatprep.subr.mxu1 %v2296_v1 }
  0xac   :  { %2115 = vmatprep.subr.mxu0 %v2296_v1  ;;  %2141 = vmatpush3.msk.msra.mxu1 %vm3363_vm4, %v2298_v15 }
  0xad   :  { %2116 = vmatpush3.msra.mxu0 %v2572_v37  ;;  %2142 = vmatprep.subr.mxu1 %v2296_v1 }
  0xae   :  { %2117 = vmatprep.subr.mxu0 %v2296_v1  ;;  %2143 = vmatpush3.msk.msra.mxu1 %vm2397_vm7, %v2298_v15 }
  0xaf   :  { %2118 = vmatpush3.msra.mxu0 %v2602_v52  ;;  %2144 = vmatprep.subr.mxu1 %v2296_v1 }
  0xb0   :  { %2119 = vmatprep.subr.mxu0 %v2296_v1  ;;  %2145 = vmatpush3.msk.msra.mxu1 %vm2426_vm8, %v2298_v15 }
  0xb1   :  { %2120 = vmatpush3.msra.mxu0 %v2630_v8  ;;  %2146 = vmatprep.subr.mxu1 %v2296_v1 }
  0xb2   :  { %2121 = vmatprep.subr.mxu0 %v2296_v1  ;;  %2147 = vmatpush3.msk.msra.mxu1 %vm3362_vm6, %v2298_v15 }
  0xb3   :  { %2122 = vmatpush3.msra.mxu0 %v2636_v10  ;;  %2148 = vmatprep.subr.mxu1 %v2296_v1 }
  0xb4   :  { %2123 = vmatprep.subr.mxu0 %v2296_v1  ;;  %2149 = vmatpush3.msk.msra.mxu1 %vm2473_vm10, %v2298_v15 }
  0xb5   :  { %2124 = vmatpush3.msra.mxu0 %v2658_v2  ;;  %2150 = vmatprep.subr.mxu1 %v2296_v1 }
  0xb6   :  { %2125 = vmatprep.subr.mxu0 %v2296_v1  ;;  %2151 = vmatpush3.msk.msra.mxu1 %vm2499_vm11, %v2298_v15 }
  0xb7   :  { %2126 = vmatpush3.msra.mxu0 %v2669_v4  ;;  %2127 = vmatprep.mubr.msk.f32.mxu0 %vm3360_vm9, %v2296_v1 }
  0xb8   :  { %2152 = vmatprep.subr.mxu1 %v2296_v1  ;;  %2128 = vmatmul.mubr.f32.vlgmr.msra.gmra.mxu0 %v2996_v46  ;;  %v3375_v46 = vld [vmem:[#allocation8_spill] sm:$0xff] }
  0xb9   :  { %2153 = vmatpush3.msk.msra.mxu1 %vm2526_vm12, %v2298_v15  ;;  %2165 = vmatprep.subr.mxu0 %v2296_v1 }
  0xba   :  { %2154 = vmatprep.subr.mxu1 %v2296_v1  ;;  %2166 = vmatpush3.msra.mxu0 %v2409_v29 }
  0xbb   :  { %2155 = vmatpush3.msk.msra.mxu1 %vm2549_vm13, %v2298_v15  ;;  %2167 = vmatprep.subr.mxu0 %v2296_v1 }
  0xbc   :  { %2156 = vmatprep.subr.mxu1 %v2296_v1  ;;  %2168 = vmatpush3.msra.mxu0 %v2412_v30 }
  0xbd   :  { %2157 = vmatpush3.msk.msra.mxu1 %vm2568_vm14, %v2298_v15  ;;  %2169 = vmatprep.subr.mxu0 %v2296_v1 }
  0xbe   :  { %2158 = vmatprep.subr.mxu1 %v2296_v1  ;;  %2170 = vmatpush3.msra.mxu0 %v2423_v33 }
  0xbf   :  { %2159 = vmatpush3.msk.msra.mxu1 %vm2584_vm15, %v2298_v15  ;;  %2171 = vmatprep.subr.mxu0 %v2296_v1  ;;  %vm3373_vm15 = vnez %v3320_v11 }
  0xc0   :  { %2160 = vmatprep.subr.mxu1 %v2296_v1  ;;  %2172 = vmatpush3.msra.mxu0 %v2439_v39 }
  0xc1   :  { %2161 = vmatpush3.msk.msra.mxu1 %vm2598_vm0, %v2298_v15  ;;  %2162 = vmatprep.mubr.msk.f32.mxu1 %vm3360_vm9, %v2296_v1 }
  0xc2   :  { %2173 = vmatprep.subr.mxu0 %v2296_v1  ;;  %2163 = vmatmul.mubr.f32.vlgmr.msra.gmra.mxu1 %v833_v3 }
  0xc3   :  { %2174 = vmatpush3.msra.mxu0 %v2455_v43  ;;  %2200 = vmatprep.subr.mxu1 %v2296_v1 }
  0xc4   :  { %2175 = vmatprep.subr.mxu0 %v2296_v1  ;;  %2201 = vmatpush3.msk.msra.mxu1 %vm3373_vm15, %v2298_v15 }
  0xc5   :  { %2176 = vmatpush3.msra.mxu0 %v2478_v51  ;;  %2202 = vmatprep.subr.mxu1 %v2296_v1 }
  0xc6   :  { %2177 = vmatprep.subr.mxu0 %v2296_v1  ;;  %2203 = vmatpush3.msk.msra.mxu1 %vm2348_vm2, %v2298_v15 }
  0xc7   :  { %2178 = vmatpush3.msra.mxu0 %v2512_v62  ;;  %2204 = vmatprep.subr.mxu1 %v2296_v1 }
  0xc8   :  { %2179 = vmatprep.subr.mxu0 %v2296_v1  ;;  %2205 = vmatpush3.msk.msra.mxu1 %vm2353_vm3, %v2298_v15 }
  0xc9   :  { %2180 = vmatpush3.msra.mxu0 %v2538_v9  ;;  %2206 = vmatprep.subr.mxu1 %v2296_v1 }
  0xca   :  { %2181 = vmatprep.subr.mxu0 %v2296_v1  ;;  %2207 = vmatpush3.msk.msra.mxu1 %vm3372_vm1, %v2298_v15  ;;  %vm3374_vm1 = vnez %v3352_v41 }
  0xcb   :  { %2182 = vmatpush3.msra.mxu0 %v2554_v19  ;;  %2208 = vmatprep.subr.mxu1 %v2296_v1 }
  0xcc   :  { %2183 = vmatprep.subr.mxu0 %v2296_v1  ;;  %2209 = vmatpush3.msk.msra.mxu1 %vm2366_vm5, %v2298_v15 }
  0xcd   :  { %2184 = vmatpush3.msra.mxu0 %v2581_v40  ;;  %2210 = vmatprep.subr.mxu1 %v2296_v1 }
  0xce   :  { %2185 = vmatprep.subr.mxu0 %v2296_v1  ;;  %2211 = vmatpush3.msk.msra.mxu1 %vm3363_vm4, %v2298_v15 }
  0xcf   :  { %2186 = vmatpush3.msra.mxu0 %v2594_v48  ;;  %2212 = vmatprep.subr.mxu1 %v2296_v1 }
  0xd0   :  { %2187 = vmatprep.subr.mxu0 %v2296_v1  ;;  %2213 = vmatpush3.msk.msra.mxu1 %vm2397_vm7, %v2298_v15  ;;  %vm2300_vm7 = vmmov 1  }
  0xd1   :  { %2188 = vmatpush3.msra.mxu0 %v2624_v0  ;;  %2214 = vmatprep.subr.mxu1 %v2296_v1 }
  0xd2   :  { %2189 = vmatprep.subr.mxu0 %v2296_v1  ;;  %2215 = vmatpush3.msk.msra.mxu1 %vm2426_vm8, %v2298_v15 }
  0xd3   :  { %2190 = vmatpush3.msra.mxu0 %v2652_v59  ;;  %2216 = vmatprep.subr.mxu1 %v2296_v1 }
  0xd4   :  { %2191 = vmatprep.subr.mxu0 %v2296_v1  ;;  %2217 = vmatpush3.msk.msra.mxu1 %vm3362_vm6, %v2298_v15 }
  0xd5   :  { %2192 = vmatpush3.msra.mxu0 %v2667_v28  ;;  %2218 = vmatprep.subr.mxu1 %v2296_v1 }
  0xd6   :  { %2193 = vmatprep.subr.mxu0 %v2296_v1  ;;  %2219 = vmatpush3.msk.msra.mxu1 %vm2473_vm10, %v2298_v15 }
  0xd7   :  { %2194 = vmatpush3.msra.mxu0 %v2685_v61  ;;  %2220 = vmatprep.subr.mxu1 %v2296_v1 }
  0xd8   :  { %2195 = vmatprep.subr.mxu0 %v2296_v1  ;;  %2221 = vmatpush3.msk.msra.mxu1 %vm2499_vm11, %v2298_v15 }
  0xd9   :  { %2196 = vmatpush3.msra.mxu0 %v2698_v32  ;;  %2197 = vmatprep.mubr.msk.f32.mxu0 %vm3360_vm9, %v2296_v1 }
  0xda   :  { %2222 = vmatprep.subr.mxu1 %v2296_v1  ;;  %2198 = vmatmul.mubr.f32.vlgmr.msra.gmra.mxu0 %v2980_v20 }
  0xdb   :  { %2223 = vmatpush3.msk.msra.mxu1 %vm2526_vm12, %v2298_v15  ;;  %2232 = vmatprep.mubr.msk.f32.mxu1 %vm3360_vm9, %v2296_v1 }
  0xdc   :  { %2224 = vmatprep.subr.mxu1 %v2296_v1  ;;  %42 = vadd.xlane.f32.xlu0 %v2965_v60 }
  0xdd   :  { %2225 = vmatpush3.msk.msra.mxu1 %vm2549_vm13, %v2298_v15  ;;  %2242 = vset.pattern.permute.xlu1 %v2299_v45 }
  0xde   :  { %2226 = vmatprep.subr.mxu1 %v2296_v1  ;;  %2243 = vset.pattern.permute.xlu0 %v2299_v45 }
  0xdf   :  { %2227 = vmatpush3.msk.msra.mxu1 %vm2568_vm14, %v2298_v15 }
  0xe0   :  { %2228 = vmatprep.subr.mxu1 %v2296_v1 }
  0xe1   :  { %2229 = vmatpush3.msk.msra.mxu1 %vm3374_vm1, %v2298_v15 }
  0xe2   :  { %2230 = vmatprep.subr.mxu1 %v2296_v1 }
  0xe3   :  { %2231 = vmatpush3.msk.msra.mxu1 %vm2598_vm0, %v2298_v15  ;;  %vm32_vm0 = vcmp.lt.s32.totalorder %v3375_v46, 8 }
  0xe4   :  { %2233 = vmatmul.mubr.f32.vlgmr.msra.gmra.mxu1 %v2980_v20  ;;  %v1610_v20 = vld [vmem:[%s3296_s2] ss:$0 sm:$0xff]  ;;  %s2301_s2 = smov [#allocation5]  }
  0xe5   :  { %s1488_s19 = sshll.u32 %s2301_s2, 4  ;;  %s1489_s19 = int_to_ptr.vmem [resolvable:$true] %s1488_s19 }
  0xe6   :  { %s2271_s20 = scalar_lea.vmem %s1489_s19, 128  ;;  %p2276_p6 = scmp.lt.s32.totalorder %s1489_s19, %s1489_s19 }
  0xe7   :  { %p2272_p5 = scmp.ne.s32.totalorder %s1489_s19, %s2271_s20  ;;  %p2277_p7 = scmp.lt.s32.totalorder %s2271_s20, %s2271_s20 }
  0xe9   :  { %p2278_p8 = por %p2277_p7, %p2276_p6 }
  0xeb   :  { %p2279_p9 = pnand %p2278_p8, %p2272_p5 }
  0xf2   :  { %v196_v2 = vpop.f32.mrf.mxu0 }
  0xf4   :  { %v1849_v11 = vpop.f32.mrf.mxu0 }
  0xfa   :  { %v347_v12 = vpop.f32.mrf.mxu1 }
  0xfb   :  { %v348_v13 = vadd.f32 %v347_v12, %v196_v2  ;;  %v1430_v2 = vadd.f32 2.0, %v1429_v56  ;;  %v1425_v12 = vmul.f32 30.0, %v3264_v55 }
  0xfc   :  { %v1884_v14 = vpop.f32.mrf.mxu1 }
  0xfd   :  { %v1432_v11 = vmax.f32 %v1430_v2, 1e-30 }
 0x112   :  { %v451_v16 = vpop.f32.mrf.mxu0 }
 0x113   :  { %v452_v21 = vadd.f32 %v451_v16, %v348_v13  ;;  %v1426_v13 = vsub.f32 10.0, %v1425_v12 }
 0x114   :  { %v1919_v22 = vpop.f32.mrf.mxu0 }
 0x11c   :  { %v540_v23 = vpop.f32.mrf.mxu1 }
 0x11d   :  { %v541_v25 = vadd.f32 %v540_v23, %v452_v21 }
 0x11e   :  { %v1954_v26 = vpop.f32.mrf.mxu1 }
 0x134   :  { %v659_v29 = vpop.f32.mrf.mxu0 }
 0x135   :  { %v660_v30 = vadd.f32 %v659_v29, %v541_v25 }
 0x136   :  { %v1989_v1 = vpop.f32.mrf.mxu0 }
 0x13e   :  { %v746_v31 = vpop.f32.mrf.mxu1 }
 0x13f   :  { %v747_v33 = vadd.f32 %v746_v31, %v660_v30  ;;  %v2250_v31 = vld [vmem:[#allocation2] sm:$0xff] }
 0x140   :  { %v2024_v34 = vpop.f32.mrf.mxu1 }
 0x141   :  { %v1401_v58 = vmul.f32 2.0, %v747_v33  ;;  %v1391_v61 = vsub.f32 %v3264_v55, %v747_v33  ;;  %v1393_v28 = vmul.f32 10.0, %v747_v33 }
 0x143   :  { %v1402_v62 = vadd.f32 2.0, %v1401_v58  ;;  %v1403_v63 = vmul.f32 14.0, %v1391_v61  ;;  %v1394_v49 = vadd.f32 10.0, %v1393_v28  ;;  %v1397_v8 = vmul.f32 30.0, %v1391_v61 }
 0x145   :  { %v1404_v5 = vadd.f32 %v1403_v63, %v1402_v62 }
 0x147   :  { %v1408_v19 = vmax.f32 %v1404_v5, 1e-30  ;;  %v1405_v17 = vmul.f32 %v2950_v7, %v1404_v5 }
 0x149   :  { %2244 = vrcp.f32 %v1408_v19 }
 0x14a   :  { %2246 = vrcp.f32 %v1432_v11 }
 0x156   :  { %v2245_v47 = vpop.eup %2244 }
 0x157   :  { %v837_v15 = vpop.f32.mrf.mxu0  ;;  %v2247_v22 = vpop.eup %2246 }
 0x159   :  { %v2059_v35 = vpop.f32.mrf.mxu0 }
 0x160   :  { %v988_v39 = vpop.f32.mrf.mxu1 }
 0x161   :  { %v989_v9 = vadd.f32 %v988_v39, %v837_v15 }
 0x162   :  { %v2094_v42 = vpop.f32.mrf.mxu1 }
 0x165   :  { %v3267_v41 = vpop.xlane.xlu0 %42 }
 0x166   :  { %v1427_v14 = vmul.f32 14.0, %v3267_v41 }
 0x168   :  { %v1428_v16 = vsub.f32 %v1426_v13, %v1427_v14 }
 0x16a   :  { %v1431_v21 = vsub.f32 0.0, %v1428_v16  ;;  %vm1436_vm4 = vcmp.lt.f32.partialorder %v1428_v16, 0.0 }
 0x16c   :  { %v1434_v23 = vmul.f32 %v2247_v22, %v1431_v21 }
 0x16e   :  { %v1435_v25 = vmin.f32 %v1434_v23, %v2950_v7 }
 0x170   :  { %v1437_v26 = vsel %vm1436_vm4, %v1435_v25, 0.0 }
 0x178   :  { %v1092_v43 = vpop.f32.mrf.mxu0 }
 0x179   :  { %v1093_v18 = vadd.f32 %v1092_v43, %v989_v9 }
 0x17a   :  { %v2129_v44 = vpop.f32.mrf.mxu0 }
 0x182   :  { %v1181_v50 = vpop.f32.mrf.mxu1 }
 0x183   :  { %v1182_v24 = vadd.f32 %v1181_v50, %v1093_v18 }
 0x184   :  { %v2164_v51 = vpop.f32.mrf.mxu1 }
 0x19a   :  { %v1300_v4 = vpop.f32.mrf.mxu0 }
 0x19b   :  { %v1301_v36 = vadd.f32 %v1300_v4, %v1182_v24 }
 0x19c   :  { %v2199_v6 = vpop.f32.mrf.mxu0 }
 0x1a4   :  { %v1387_v37 = vpop.f32.mrf.mxu1 }
 0x1a5   :  { %v1388_v40 = vadd.f32 %v1387_v37, %v1301_v36 }
 0x1a6   :  { %v2234_v48 = vpop.f32.mrf.mxu1 }
 0x1a7   :  { %v1392_v52 = vsub.f32 %v3267_v41, %v1388_v40  ;;  %v1395_v0 = vmul.f32 2.0, %v1388_v40 }
 0x1a9   :  { %v1396_v10 = vsub.f32 %v1394_v49, %v1395_v0  ;;  %v1399_v32 = vmul.f32 14.0, %v1392_v52 }
 0x1ab   :  { %v1398_v59 = vsub.f32 %v1396_v10, %v1397_v8 }
 0x1ad   :  { %v1400_v38 = vsub.f32 %v1398_v59, %v1399_v32 }
 0x1af   :  { %v1406_v57 = vadd.f32 %v1405_v17, %v1400_v38  ;;  %v1407_v27 = vsub.f32 0.0, %v1400_v38 }
 0x1b1   :  { %v1410_v3 = vmul.f32 %v2245_v47, %v1407_v27  ;;  %vm1418_vm2 = vcmp.lt.f32.partialorder %v1406_v57, 0.0 }
 0x1b2   :  { %vm1421_vm3 = vmand %vm32_vm0, %vm1418_vm2 }
 0x1b3   :  { %v1417_v53 = vmin.f32 %v1410_v3, %v1610_v20 }
 0x1b5   :  { %v1422_v54 = vsel %vm1421_vm3, %v1417_v53, 0.0 }
 0x1b6   :  { %1423 = vmax.xlane.f32.xlu1 %v1422_v54 }
 0x23f   :  { %v1424_v29 = vpop.xlane.xlu1 %1423 }
 0x240   :  { %v1438_v30 = vmax.f32 %v1424_v29, %v1437_v26 }
 0x242   :  { %1441 = vperm.xlu1 %2242, %v1438_v30  }
 0x2bd   :  { %v1442_v1 = vpop.permute.xlu1 %1441 }
 0x2be   :  { %vm1444_vm5 = vcmp.le.f32.partialorder %v2950_v7, %v1442_v1 }
 0x2bf   :  { %vm1445_vm6 = vmand %vm1444_vm5, %vm32_vm0 }
 0x2c0   :  { %v1446_v33 = vsel %vm1445_vm6, %v2250_v31, 0.0  ;;  %v1449_v34 = vsel %vm1445_vm6, %v2965_v60, 0.0  ;;  %vm1473_vm8 = vmxor %vm1445_vm6, %vm2300_vm7  ;;  %v1470_v15 = vsel %vm1445_vm6, %v2950_v7, 0.0 }
 0x2c1   :  { %1447 = vadd.xlane.f32.xlu0 %v1446_v33  ;;  %vm1474_vm9 = vmand %vm32_vm0, %vm1473_vm8 }
 0x2c2   :  { %v1475_v35 = vsel %vm1474_vm9, %v2950_v7, 1e+30 }
 0x2c5   :  { %1450 = vadd.xlane.f32.xlu0 %v1449_v34 }
 0x2c9   :  { %1471 = vmax.xlane.f32.xlu0 %v1470_v15 }
 0x2cd   :  { %1476 = vmin.xlane.f32.xlu0 %v1475_v35 }
 0x34a   :  { %v1448_v39 = vpop.xlane.xlu0 %1447 }
 0x34b   :  { %v1456_v42 = vsub.f32 %v3264_v55, %v1448_v39  ;;  %v1462_v43 = vmul.f32 2.0, %v1448_v39  ;;  %v1452_v44 = vmul.f32 10.0, %v1448_v39 }
 0x34d   :  { %v1463_v50 = vadd.f32 2.0, %v1462_v43  ;;  %v1464_v51 = vmul.f32 14.0, %v1456_v42  ;;  %v1453_v62 = vadd.f32 10.0, %v1452_v44  ;;  %v1457_v5 = vmul.f32 30.0, %v1456_v42 }
 0x34e   :  { %v1451_v60 = vpop.xlane.xlu0 %1450 }
 0x34f   :  { %v1465_v58 = vadd.f32 %v1464_v51, %v1463_v50  ;;  %v1454_v61 = vmul.f32 2.0, %v1451_v60  ;;  %v1459_v6 = vsub.f32 %v3267_v41, %v1451_v60 }
 0x351   :  { %v1467_v63 = vmax.f32 %v1465_v58, 1e-30  ;;  %v1455_v4 = vsub.f32 %v1453_v62, %v1454_v61  ;;  %v1460_v7 = vmul.f32 14.0, %v1459_v6 }
 0x352   :  { %v1472_v19 = vpop.xlane.xlu0 %1471 }
 0x353   :  { %2248 = vrcp.f32 %v1467_v63  ;;  %v1458_v9 = vsub.f32 %v1455_v4, %v1457_v5 }
 0x355   :  { %v1461_v18 = vsub.f32 %v1458_v9, %v1460_v7 }
 0x356   :  { %v1477_v37 = vpop.xlane.xlu0 %1476 }
 0x357   :  { %v1466_v24 = vsub.f32 0.0, %v1461_v18 }
 0x360   :  { %v2249_v55 = vpop.eup %2248 }
 0x361   :  { %v1469_v28 = vmul.f32 %v2249_v55, %v1466_v24 }
 0x363   :  { %v1478_v36 = vmax.f32 %v1472_v19, %v1469_v28 }
 0x365   :  { %v1479_v40 = vmin.f32 %v1477_v37, %v1478_v36 }
 0x367   :  { %v1480_v48 = vmax.f32 %v1479_v40, 0.0 }
 0x369   :  { %1481 = vst [vmem:[#allocation5] sm:$0xff] %v1480_v48 }
 0x36a   :  { %2282 = shalt.err (!%p2279_p9)
}
 0x36b   :  { %1491 = dma.vmem_to_hbm [thread:$0]  %s1489_s19, 128, %s3297_s3, [#allocation4]  }
 0x36c   :  { %2293 = dma.done.wait [#allocation4], 128  }
 0x36d   :  { %2294 = vsyncadd [#allocation4], 4294967168 }
 0x36e   :  { %1495 = vsyncpa [#allocation3], 1 }
 0x36f   :  { %1496 = vsyncpa [#allocation4], 1 }

</bundles_post_ra>
